<compile_context>
chip_gen: v7x
topology: tpu7x:2x2x1
jax: 0.10.0
libtpu: 0.0.40
codegen_flags: <defaults>
</compile_context>

<pallas_src>
import functools

import jax
import jax.numpy as jnp
from jax.experimental import pallas as pl
from jax.experimental.pallas import tpu as pltpu

LANE = 128      # vreg lane width
SUBLANE = 8     # vreg sublane count (f32)


def _round_up(n, m):
    return ((n + m - 1) // m) * m


def _mlp_kernel(x_ref, w1_ref, b1_ref, w2_ref, b2_ref, w3_ref, b3_ref, o_ref):
    # x tile: (TB, 128) bf16, weights: 128x128 bf16 (resident), biases: (1,128) f32.
    x = x_ref[...]

    # lin1 + ReLU (bias/ReLU ride in VPU slots under the MXU work)
    h = jnp.dot(x, w1_ref[...], preferred_element_type=jnp.float32) + b1_ref[...]
    h = jnp.maximum(h, 0.0)

    # dropout (p=0.1) -> identity in eval mode

    # lin2 + ReLU
    h = jnp.dot(h.astype(jnp.bfloat16), w2_ref[...],
                preferred_element_type=jnp.float32) + b2_ref[...]
    h = jnp.maximum(h, 0.0)

    # lin3 + Sigmoid (EUP)
    z = jnp.dot(h.astype(jnp.bfloat16), w3_ref[...],
                preferred_element_type=jnp.float32) + b3_ref[...]
    o_ref[...] = jax.nn.sigmoid(z)


def pad_params(w1, b1, w2, b2, w3, b3):
    """Zero-pad every feature dim to a multiple of 128; weights -> bf16, biases f32.

    Zero padding is exact: padded x columns are zero, padded weight rows/cols are
    zero, padded bias entries are zero, and padded output columns are sliced off.
    """
    def pad_w(w):
        fi, fo = w.shape
        wp = jnp.zeros((_round_up(fi, LANE), _round_up(fo, LANE)), jnp.float32)
        return wp.at[:fi, :fo].set(w).astype(jnp.bfloat16)

    def pad_b(b):
        fo = b.shape[-1]
        bp = jnp.zeros((1, _round_up(fo, LANE)), jnp.float32)
        return bp.at[:, :fo].set(b.reshape(1, -1))

    return pad_w(w1), pad_b(b1), pad_w(w2), pad_b(b2), pad_w(w3), pad_b(b3)


@functools.partial(jax.jit, static_argnames=("out_dim",))
def animal_classifier_forward(x, w1p, b1p, w2p, b2p, w3p, b3p, *, out_dim):
    """x: (batch, in_dim) f32. Padded/bf16 params from pad_params. Returns f32."""
    batch, in_dim = x.shape
    in_pad = w1p.shape[0]
    out_pad = w3p.shape[1]

    # Batch tile: single shot for small batches, 256-row pipelined tiles otherwise.
    tb = 256 if batch >= 256 else _round_up(batch, SUBLANE)
    batch_pad = _round_up(batch, tb)

    # Pad x once in the wrapper (lane-dense bf16 input for the kernel).
    xp = jnp.zeros((batch_pad, in_pad), jnp.bfloat16)
    xp = xp.at[:batch, :in_dim].set(x.astype(jnp.bfloat16))

    weight_spec = lambda shape: pl.BlockSpec(shape, lambda i: (0, 0))

    out = pl.pallas_call(
        _mlp_kernel,
        out_shape=jax.ShapeDtypeStruct((batch_pad, out_pad), jnp.float32),
        grid_spec=pltpu.PrefetchScalarGridSpec(
            num_scalar_prefetch=0,
            grid=(batch_pad // tb,),
            in_specs=[
                pl.BlockSpec((tb, in_pad), lambda i: (i, 0)),   # x: batch-tiled
                weight_spec(w1p.shape), weight_spec(b1p.shape),  # params: resident
                weight_spec(w2p.shape), weight_spec(b2p.shape),
                weight_spec(w3p.shape), weight_spec(b3p.shape),
            ],
            out_specs=pl.BlockSpec((tb, out_pad), lambda i: (i, 0)),
        ),
        compiler_params=pltpu.CompilerParams(
            dimension_semantics=("parallel",),  # shard batch tiles across TCs on v7x
        ),
    )(xp, w1p, b1p, w2p, b2p, w3p, b3p)

    return out[:batch, :out_dim]


def init_params(key, in_dim, hid_dim, out_dim):
    """nn.Linear-style init (uniform +/- 1/sqrt(fan_in)).

    Weights stored as (in_features, out_features) (transposed vs. PyTorch),
    biases as (out_features,), both f32 and unpadded (logical shapes).
    """
    dims = [(in_dim, hid_dim), (hid_dim, hid_dim // 2), (hid_dim // 2, out_dim)]
    params = []
    for fan_in, fan_out in dims:
        key, kw, kb = jax.random.split(key, 3)
        bound = 1.0 / jnp.sqrt(fan_in)
        w = jax.random.uniform(kw, (fan_in, fan_out), jnp.float32, -bound, bound)
        b = jax.random.uniform(kb, (fan_out,), jnp.float32, -bound, bound)
        params += [w, b]
    return params


def reference_forward(x, w1, b1, w2, b2, w3, b3):
    h = jnp.maximum(x @ w1 + b1, 0.0)
    h = jnp.maximum(h @ w2 + b2, 0.0)
    return jax.nn.sigmoid(h @ w3 + b3)


if __name__ == "__main__":
    batch, in_dim, hid_dim, out_dim = 8, 32, 32, 4

    key = jax.random.PRNGKey(0)
    key, kx = jax.random.split(key)
    x = jax.random.normal(kx, (batch, in_dim), jnp.float32)

    w1, b1, w2, b2, w3, b3 = init_params(key, in_dim, hid_dim, out_dim)

    # Pad + cast parameters once (outside the per-call path).
    padded = pad_params(w1, b1, w2, b2, w3, b3)

    out = animal_classifier_forward(x, *padded, out_dim=out_dim)
    out = jax.block_until_ready(out)

    ref = reference_forward(x, w1, b1, w2, b2, w3, b3)
    assert out.shape == (batch, out_dim)
    # bf16 matmul inputs (f32 accumulation) -> loosen tolerance vs f32 reference.
    assert jnp.allclose(out, ref, atol=2e-2, rtol=2e-2), (
        f"max abs err {jnp.max(jnp.abs(out - ref))}")

    print("KERNEL_OK")
</pallas_src>

<mosaic_0001>
module attributes {stable_mosaic.version = 11 : i64} {
  func.func @_mlp_kernel(%arg0: i32, %arg1: memref<8x128xbf16, #tpu.memory_space<vmem>>, %arg2: memref<128x128xbf16, #tpu.memory_space<vmem>>, %arg3: memref<1x128xf32, #tpu.memory_space<vmem>>, %arg4: memref<128x128xbf16, #tpu.memory_space<vmem>>, %arg5: memref<1x128xf32, #tpu.memory_space<vmem>>, %arg6: memref<128x128xbf16, #tpu.memory_space<vmem>>, %arg7: memref<1x128xf32, #tpu.memory_space<vmem>>, %arg8: memref<8x128xf32, #tpu.memory_space<vmem>>) attributes {dimension_semantics = [#tpu.dimension_semantics<parallel>], iteration_bounds = array<i64: 1>, scalar_prefetch = 0 : i64, scratch_operands = 0 : i64, tpu.core_type = #tpu.core_type<tc>, window_params = [{transform_indices = @transform_0, window_bounds = array<i64: 8, 128>}, {pipeline_mode = #tpu.pipeline_mode<synchronous>, transform_indices = @transform_1, window_bounds = array<i64: 128, 128>}, {pipeline_mode = #tpu.pipeline_mode<synchronous>, transform_indices = @transform_2, window_bounds = array<i64: 1, 128>}, {pipeline_mode = #tpu.pipeline_mode<synchronous>, transform_indices = @transform_3, window_bounds = array<i64: 128, 128>}, {pipeline_mode = #tpu.pipeline_mode<synchronous>, transform_indices = @transform_4, window_bounds = array<i64: 1, 128>}, {pipeline_mode = #tpu.pipeline_mode<synchronous>, transform_indices = @transform_5, window_bounds = array<i64: 128, 128>}, {pipeline_mode = #tpu.pipeline_mode<synchronous>, transform_indices = @transform_6, window_bounds = array<i64: 1, 128>}, {transform_indices = @transform_7, window_bounds = array<i64: 8, 128>}]} {
    %c0 = arith.constant 0 : index
    %c0_0 = arith.constant 0 : index
    %0 = vector.load %arg1[%c0, %c0_0] : memref<8x128xbf16, #tpu.memory_space<vmem>>, vector<8x128xbf16>
    %c0_1 = arith.constant 0 : index
    %c0_2 = arith.constant 0 : index
    %1 = vector.load %arg2[%c0_1, %c0_2] : memref<128x128xbf16, #tpu.memory_space<vmem>>, vector<128x128xbf16>
    %cst = arith.constant dense<0.000000e+00> : vector<8x128xf32>
    %2 = tpu.matmul %0, %1, %cst {dimension_numbers = #tpu.dot_dimension_numbers<[1], [0], [0], [1], [0, 0, 1, 1], [], []>} : vector<8x128xbf16>, vector<128x128xbf16>, vector<8x128xf32> -> vector<8x128xf32>
    %c0_3 = arith.constant 0 : index
    %c0_4 = arith.constant 0 : index
    %3 = vector.load %arg3[%c0_3, %c0_4] : memref<1x128xf32, #tpu.memory_space<vmem>>, vector<1x128xf32>
    %4 = vector.broadcast %3 : vector<1x128xf32> to vector<8x128xf32>
    %5 = arith.addf %2, %4 : vector<8x128xf32>
    %cst_5 = arith.constant 0.000000e+00 : f32
    %6 = vector.broadcast %cst_5 : f32 to vector<8x128xf32>
    %7 = arith.maximumf %5, %6 : vector<8x128xf32>
    %8 = arith.truncf %7 : vector<8x128xf32> to vector<8x128xbf16>
    %c0_6 = arith.constant 0 : index
    %c0_7 = arith.constant 0 : index
    %9 = vector.load %arg4[%c0_6, %c0_7] : memref<128x128xbf16, #tpu.memory_space<vmem>>, vector<128x128xbf16>
    %cst_8 = arith.constant dense<0.000000e+00> : vector<8x128xf32>
    %10 = tpu.matmul %8, %9, %cst_8 {dimension_numbers = #tpu.dot_dimension_numbers<[1], [0], [0], [1], [0, 0, 1, 1], [], []>} : vector<8x128xbf16>, vector<128x128xbf16>, vector<8x128xf32> -> vector<8x128xf32>
    %c0_9 = arith.constant 0 : index
    %c0_10 = arith.constant 0 : index
    %11 = vector.load %arg5[%c0_9, %c0_10] : memref<1x128xf32, #tpu.memory_space<vmem>>, vector<1x128xf32>
    %12 = vector.broadcast %11 : vector<1x128xf32> to vector<8x128xf32>
    %13 = arith.addf %10, %12 : vector<8x128xf32>
    %cst_11 = arith.constant 0.000000e+00 : f32
    %14 = vector.broadcast %cst_11 : f32 to vector<8x128xf32>
    %15 = arith.maximumf %13, %14 : vector<8x128xf32>
    %16 = arith.truncf %15 : vector<8x128xf32> to vector<8x128xbf16>
    %c0_12 = arith.constant 0 : index
    %c0_13 = arith.constant 0 : index
    %17 = vector.load %arg6[%c0_12, %c0_13] : memref<128x128xbf16, #tpu.memory_space<vmem>>, vector<128x128xbf16>
    %cst_14 = arith.constant dense<0.000000e+00> : vector<8x128xf32>
    %18 = tpu.matmul %16, %17, %cst_14 {dimension_numbers = #tpu.dot_dimension_numbers<[1], [0], [0], [1], [0, 0, 1, 1], [], []>} : vector<8x128xbf16>, vector<128x128xbf16>, vector<8x128xf32> -> vector<8x128xf32>
    %c0_15 = arith.constant 0 : index
    %c0_16 = arith.constant 0 : index
    %19 = vector.load %arg7[%c0_15, %c0_16] : memref<1x128xf32, #tpu.memory_space<vmem>>, vector<1x128xf32>
    %20 = vector.broadcast %19 : vector<1x128xf32> to vector<8x128xf32>
    %21 = arith.addf %18, %20 : vector<8x128xf32>
    %22 = arith.negf %21 : vector<8x128xf32>
    %23 = math.exp %22 : vector<8x128xf32>
    %cst_17 = arith.constant 1.000000e+00 : f32
    %24 = vector.broadcast %cst_17 : f32 to vector<8x128xf32>
    %25 = arith.addf %24, %23 : vector<8x128xf32>
    %26 = arith.divf %24, %25 : vector<8x128xf32>
    %c0_18 = arith.constant 0 : index
    %c0_19 = arith.constant 0 : index
    %27 = vector.load %arg8[%c0_18, %c0_19] : memref<8x128xf32, #tpu.memory_space<vmem>>, vector<8x128xf32>
    tpu.vector_store %arg8[%c0_18, %c0_19], %26 {strides = array<i32>} : memref<8x128xf32, #tpu.memory_space<vmem>>, vector<8x128xf32>,
    return
  }
  func.func @transform_0(%arg0: i32) -> (i32, i32) {
    %c0_i32 = arith.constant 0 : i32
    %c0_i32_0 = arith.constant 0 : i32
    return %arg0, %c0_i32 : i32, i32
  }
  func.func @transform_1(%arg0: i32) -> (i32, i32) {
    %c0_i32 = arith.constant 0 : i32
    %c0_i32_0 = arith.constant 0 : i32
    %c0_i32_1 = arith.constant 0 : i32
    return %c0_i32, %c0_i32_0 : i32, i32
  }
  func.func @transform_2(%arg0: i32) -> (i32, i32) {
    %c0_i32 = arith.constant 0 : i32
    %c0_i32_0 = arith.constant 0 : i32
    %c0_i32_1 = arith.constant 0 : i32
    return %c0_i32, %c0_i32_0 : i32, i32
  }
  func.func @transform_3(%arg0: i32) -> (i32, i32) {
    %c0_i32 = arith.constant 0 : i32
    %c0_i32_0 = arith.constant 0 : i32
    %c0_i32_1 = arith.constant 0 : i32
    return %c0_i32, %c0_i32_0 : i32, i32
  }
  func.func @transform_4(%arg0: i32) -> (i32, i32) {
    %c0_i32 = arith.constant 0 : i32
    %c0_i32_0 = arith.constant 0 : i32
    %c0_i32_1 = arith.constant 0 : i32
    return %c0_i32, %c0_i32_0 : i32, i32
  }
  func.func @transform_5(%arg0: i32) -> (i32, i32) {
    %c0_i32 = arith.constant 0 : i32
    %c0_i32_0 = arith.constant 0 : i32
    %c0_i32_1 = arith.constant 0 : i32
    return %c0_i32, %c0_i32_0 : i32, i32
  }
  func.func @transform_6(%arg0: i32) -> (i32, i32) {
    %c0_i32 = arith.constant 0 : i32
    %c0_i32_0 = arith.constant 0 : i32
    %c0_i32_1 = arith.constant 0 : i32
    return %c0_i32, %c0_i32_0 : i32, i32
  }
  func.func @transform_7(%arg0: i32) -> (i32, i32) {
    %c0_i32 = arith.constant 0 : i32
    %c0_i32_0 = arith.constant 0 : i32
    return %arg0, %c0_i32 : i32, i32
  }
}

</mosaic_0001>

<bundles_post_ra>
// kernel: animal_classifier_forward.1
= control target key start
LH: loop header
LB: loop body
LE: loop exit
PB: predicated region body
PF: predicated region fallthrough
CT: control target
= control target key end

     0   :  { %12 = vsyncpa [#allocation3], 0  ;;  %s783_s0 = inlined_call_operand.vmem [shape: bf16[8,128], index: 0, kind: input, shape index: {}]   ;;  %s784_s1 = inlined_call_operand.hbm [shape: bf16[128,128], index: 1, kind: input, shape index: {}]   ;;  %s785_s2 = inlined_call_operand.vmem [shape: f32[1,128], index: 2, kind: input, shape index: {}]   ;;  %s786_s3 = inlined_call_operand.hbm [shape: bf16[128,128], index: 3, kind: input, shape index: {}]   ;;  %s787_s4 = inlined_call_operand.vmem [shape: f32[1,128], index: 4, kind: input, shape index: {}]   ;;  %s788_s5 = inlined_call_operand.hbm [shape: bf16[128,128], index: 5, kind: input, shape index: {}]   ;;  %s789_s6 = inlined_call_operand.vmem [shape: f32[1,128], index: 6, kind: input, shape index: {}]   ;;  %s790_s7 = inlined_call_operand.vmem [shape: f32[8,128], index: 7, kind: output, shape index: {}]  }
   0x1   :  { %13 = vsyncpa [#allocation5], 0  ;;  %s639_s24 = smov [#allocation4]   ;;  %s640_s26 = smov [#allocation2]  }
   0x2   :  { %s35_s25 = sshll.u32 %s639_s24, 4  ;;  %s21_s27 = sshll.u32 %s640_s26, 4  ;;  %s36_s25 = int_to_ptr.vmem [resolvable:$true] %s35_s25  ;;  %s686_s27 = int_to_ptr.vmem [resolvable:$true] %s21_s27 }
   0x3   :  { %s569_s30 = scalar_lea.hbm %s786_s3, 1024 }
   0x4   :  { %p570_p0 = scmp.ne.s32.totalorder %s786_s3, %s569_s30  ;;  %p573_p1 = scmp.lt.u32.totalorder %s569_s30, %s786_s3 }
   0x6   :  { %p575_p2 = pnand %p573_p1, %p570_p0 }
   0x8   :  { %578 = shalt.err (!%p575_p2)
}
   0x9   :  { %s579_s12 = scalar_lea.vmem %s36_s25, 1024  ;;  %p584_p4 = scmp.lt.s32.totalorder %s36_s25, %s36_s25 }
   0xa   :  { %p580_p3 = scmp.ne.s32.totalorder %s36_s25, %s579_s12  ;;  %p585_p5 = scmp.lt.s32.totalorder %s579_s12, %s579_s12 }
   0xc   :  { %p586_p6 = por %p585_p5, %p584_p4 }
   0xe   :  { %p587_p7 = pnand %p586_p6, %p580_p3 }
  0x10   :  { %590 = shalt.err (!%p587_p7)
}
  0x11   :  { %s641_s13 = smov 64   ;;  %s642_s14 = smov 4  }
  0x12   :  { %41 = dma.hbm_to_vmem [thread:$0]  %s786_s3, 1024, %s36_s25, [#allocation5], %s641_s13, %s641_s13, %s642_s14  }
  0x13   :  { %s591_s19 = scalar_lea.hbm %s784_s1, 1024 }
  0x14   :  { %p592_p8 = scmp.ne.s32.totalorder %s784_s1, %s591_s19  ;;  %p595_p9 = scmp.lt.u32.totalorder %s591_s19, %s784_s1 }
  0x16   :  { %p597_p10 = pnand %p595_p9, %p592_p8 }
  0x18   :  { %600 = shalt.err (!%p597_p10)
}
  0x19   :  { %s601_s24 = scalar_lea.vmem %s686_s27, 1024  ;;  %p606_p12 = scmp.lt.s32.totalorder %s686_s27, %s686_s27 }
  0x1a   :  { %p602_p11 = scmp.ne.s32.totalorder %s686_s27, %s601_s24  ;;  %p607_p13 = scmp.lt.s32.totalorder %s601_s24, %s601_s24 }
  0x1c   :  { %p608_p0 = por %p607_p13, %p606_p12 }
  0x1e   :  { %p609_p1 = pnand %p608_p0, %p602_p11 }
  0x20   :  { %612 = shalt.err (!%p609_p1)
}
  0x21   :  { %27 = dma.hbm_to_vmem [thread:$0]  %s784_s1, 1024, %s686_s27, [#allocation3], %s641_s13, %s641_s13, %s642_s14  }
  0x22   :  { %s643_s26 = smov [#allocation6]   ;;  %s613_s8 = scalar_lea.hbm %s788_s5, 1024 }
  0x23   :  { %s49_s28 = sshll.u32 %s643_s26, 4  ;;  %p614_p2 = scmp.ne.s32.totalorder %s788_s5, %s613_s8  ;;  %s50_s28 = int_to_ptr.vmem [resolvable:$true] %s49_s28 }
  0x24   :  { %p617_p3 = scmp.lt.u32.totalorder %s613_s8, %s788_s5 }
  0x26   :  { %p619_p4 = pnand %p617_p3, %p614_p2 }
  0x28   :  { %622 = shalt.err (!%p619_p4)
}
  0x29   :  { %s623_s15 = scalar_lea.vmem %s50_s28, 1024  ;;  %p628_p6 = scmp.lt.s32.totalorder %s50_s28, %s50_s28 }
  0x2a   :  { %p624_p5 = scmp.ne.s32.totalorder %s50_s28, %s623_s15  ;;  %p629_p7 = scmp.lt.s32.totalorder %s623_s15, %s623_s15 }
  0x2c   :  { %p630_p8 = por %p629_p7, %p628_p6 }
  0x2e   :  { %p631_p9 = pnand %p630_p8, %p624_p5 }
  0x30   :  { %634 = shalt.err (!%p631_p9)
}
  0x31   :  { %55 = dma.hbm_to_vmem [thread:$0]  %s788_s5, 1024, %s50_s28, [#allocation5], %s641_s13, %s641_s13, %s642_s14  }
  0x32   :  { %635 = dma.done.wait [#allocation3], 1024  }
  0x33   :  { %636 = vsyncadd [#allocation3], 4294966272 }
  0x34   :  { %637 = dma.done.wait [#allocation5], 2048  }
  0x35   :  { %638 = vsyncadd [#allocation5], 4294965248  ;;  %v644_v0 = vmov 0.0   ;;  %vm645_vm0 = vmmov 0   ;;  %v541_v1 = vld [vmem:[#allocation2] sm:$0xff]   ;;  %v542_v2 = vld [vmem:[#allocation2 + $0x8] sm:$0xff]  }
  0x36   :  { %474 = vmatprep.subr.bf16.mxu0 %v644_v0  ;;  %490 = vmatprep.mubr.msk.bf16.mxu0 %vm645_vm0, %v644_v0  ;;  %v543_v3 = vld [vmem:[#allocation2 + $0x10] sm:$0xff]   ;;  %v549_v4 = vld [vmem:[#allocation4] sm:$0xff]   ;;  %v544_v5 = vld [vmem:[#allocation2 + $0x18] sm:$0xff]  }
  0x37   :  { %494 = vmatprep.subr.bf16.mxu1 %v644_v0  ;;  %510 = vmatprep.mubr.msk.bf16.mxu1 %vm645_vm0, %v644_v0  ;;  %v550_v6 = vld [vmem:[#allocation4 + $0x8] sm:$0xff]   ;;  %v545_v7 = vld [vmem:[#allocation2 + $0x20] sm:$0xff]   ;;  %v551_v8 = vld [vmem:[#allocation4 + $0x10] sm:$0xff]  }
  0x38   :  { %475 = vmatpush3.bf16.msra.mxu0 %v541_v1  ;;  %495 = vmatpush3.bf16.msra.mxu1 %v549_v4  ;;  %v546_v9 = vld [vmem:[#allocation2 + $0x28] sm:$0xff]   ;;  %v552_v10 = vld [vmem:[#allocation4 + $0x18] sm:$0xff]   ;;  %v547_v11 = vld [vmem:[#allocation2 + $0x30] sm:$0xff]  }
  0x39   :  { %476 = vmatprep.subr.bf16.mxu0 %v644_v0  ;;  %496 = vmatprep.subr.bf16.mxu1 %v644_v0  ;;  %v553_v12 = vld [vmem:[#allocation4 + $0x20] sm:$0xff]   ;;  %v548_v13 = vld [vmem:[#allocation2 + $0x38] sm:$0xff]   ;;  %v554_v14 = vld [vmem:[#allocation4 + $0x28] sm:$0xff]  }
  0x3a   :  { %v68_v15 = vld [vmem:[%s783_s0] sm:$0xf]  ;;  %v555_v16 = vld [vmem:[#allocation4 + $0x30] sm:$0xff]   ;;  %v556_v17 = vld [vmem:[#allocation4 + $0x38] sm:$0xff]  }
  0x3b   :  { %v557_v18 = vld [vmem:[#allocation6] sm:$0xff]   ;;  %v558_v19 = vld [vmem:[#allocation6 + $0x8] sm:$0xff]   ;;  %v559_v20 = vld [vmem:[#allocation6 + $0x10] sm:$0xff]  }
  0x3c   :  { %477 = vmatpush3.bf16.msra.mxu0 %v542_v2  ;;  %497 = vmatpush3.bf16.msra.mxu1 %v550_v6  ;;  %v560_v21 = vld [vmem:[#allocation6 + $0x18] sm:$0xff]   ;;  %v561_v22 = vld [vmem:[#allocation6 + $0x20] sm:$0xff]   ;;  %v562_v23 = vld [vmem:[#allocation6 + $0x28] sm:$0xff]  }
  0x3d   :  { %478 = vmatprep.subr.bf16.mxu0 %v644_v0  ;;  %498 = vmatprep.subr.bf16.mxu1 %v644_v0  ;;  %v419_v24 = vld [vmem:[%s785_s2] ss:$0 sm:$0xff]  ;;  %v563_v32 = vld [vmem:[#allocation6 + $0x30] sm:$0xff]   ;;  %v564_v33 = vld [vmem:[#allocation6 + $0x38] sm:$0xff]  }
  0x3e   :  { %v428_v34 = vld [vmem:[%s787_s4] ss:$0 sm:$0xff] }
  0x3f   :  { %v437_v42 = vld [vmem:[%s789_s6] ss:$0 sm:$0xff] }
  0x40   :  { %479 = vmatpush3.bf16.msra.mxu0 %v543_v3  ;;  %499 = vmatpush3.bf16.msra.mxu1 %v551_v8 }
  0x41   :  { %480 = vmatprep.subr.bf16.mxu0 %v644_v0  ;;  %500 = vmatprep.subr.bf16.mxu1 %v644_v0 }
  0x44   :  { %481 = vmatpush3.bf16.msra.mxu0 %v544_v5  ;;  %501 = vmatpush3.bf16.msra.mxu1 %v552_v10 }
  0x45   :  { %482 = vmatprep.subr.bf16.mxu0 %v644_v0  ;;  %502 = vmatprep.subr.bf16.mxu1 %v644_v0 }
  0x48   :  { %483 = vmatpush3.bf16.msra.mxu0 %v545_v7  ;;  %503 = vmatpush3.bf16.msra.mxu1 %v553_v12 }
  0x49   :  { %484 = vmatprep.subr.bf16.mxu0 %v644_v0  ;;  %504 = vmatprep.subr.bf16.mxu1 %v644_v0 }
  0x4c   :  { %485 = vmatpush3.bf16.msra.mxu0 %v546_v9  ;;  %505 = vmatpush3.bf16.msra.mxu1 %v554_v14 }
  0x4d   :  { %486 = vmatprep.subr.bf16.mxu0 %v644_v0  ;;  %506 = vmatprep.subr.bf16.mxu1 %v644_v0 }
  0x50   :  { %487 = vmatpush3.bf16.msra.mxu0 %v547_v11  ;;  %507 = vmatpush3.bf16.msra.mxu1 %v555_v16 }
  0x51   :  { %488 = vmatprep.subr.bf16.mxu0 %v644_v0  ;;  %508 = vmatprep.subr.bf16.mxu1 %v644_v0 }
  0x54   :  { %489 = vmatpush3.bf16.msra.mxu0 %v548_v13  ;;  %509 = vmatpush3.bf16.msra.mxu1 %v556_v17 }
  0x55   :  { %514 = vmatprep.subr.bf16.mxu0 %v644_v0 }
  0x57   :  { %491 = vmatmul.mubr.bf16.vlgmr.msra.gmra.mrb[0].mxu0 %v68_v15 }
  0x58   :  { %530 = vmatprep.mubr.msk.bf16.mxu0 %vm645_vm0, %v644_v0  ;;  %515 = vmatpush3.bf16.msra.mxu0 %v557_v18 }
  0x59   :  { %516 = vmatprep.subr.bf16.mxu0 %v644_v0 }
  0x5c   :  { %517 = vmatpush3.bf16.msra.mxu0 %v558_v19 }
  0x5d   :  { %518 = vmatprep.subr.bf16.mxu0 %v644_v0 }
  0x60   :  { %519 = vmatpush3.bf16.msra.mxu0 %v559_v20 }
  0x61   :  { %520 = vmatprep.subr.bf16.mxu0 %v644_v0 }
  0x64   :  { %521 = vmatpush3.bf16.msra.mxu0 %v560_v21 }
  0x65   :  { %522 = vmatprep.subr.bf16.mxu0 %v644_v0 }
  0x68   :  { %523 = vmatpush3.bf16.msra.mxu0 %v561_v22 }
  0x69   :  { %524 = vmatprep.subr.bf16.mxu0 %v644_v0 }
  0x6c   :  { %525 = vmatpush3.bf16.msra.mxu0 %v562_v23 }
  0x6d   :  { %526 = vmatprep.subr.bf16.mxu0 %v644_v0 }
  0x70   :  { %527 = vmatpush3.bf16.msra.mxu0 %v563_v32 }
  0x71   :  { %528 = vmatprep.subr.bf16.mxu0 %v644_v0 }
  0x74   :  { %529 = vmatpush3.bf16.msra.mxu0 %v564_v33 }
 0x12a   :  { %v174_v25 = vpop.f32.mrb[0].mxu0 }
 0x12b   :  { %v175_v26 = vadd.f32 %v419_v24, %v174_v25  ;;  %v492_v27 = vpop.f32.mrb[1].mxu0 }
 0x12c   :  { %v177_v28 = vpop.f32.mrb[2].mxu0 }
 0x12d   :  { %v180_v29 = vmax.f32 %v175_v26, 0.0  ;;  %v493_v30 = vpop.f32.mrb[3].mxu0 }
 0x12f   :  { %v181_v31 = vpack.c.bf16 %v180_v29, %v180_v29 }
 0x131   :  { %511 = vmatmul.mubr.bf16.vlgmr.msra.gmra.mrb[0].mxu1 %v181_v31 }
 0x204   :  { %v287_v35 = vpop.f32.mrb[0].mxu1 }
 0x205   :  { %v288_v36 = vadd.f32 %v428_v34, %v287_v35  ;;  %v512_v37 = vpop.f32.mrb[1].mxu1 }
 0x206   :  { %v290_v38 = vpop.f32.mrb[2].mxu1 }
 0x207   :  { %v293_v39 = vmax.f32 %v288_v36, 0.0  ;;  %v513_v40 = vpop.f32.mrb[3].mxu1 }
 0x209   :  { %v294_v41 = vpack.c.bf16 %v293_v39, %v293_v39 }
 0x20b   :  { %531 = vmatmul.mubr.bf16.vlgmr.msra.gmra.mrb[4].mxu0 %v294_v41 }
 0x2de   :  { %v400_v43 = vpop.f32.mrb[4].mxu0 }
 0x2df   :  { %v401_v44 = vadd.f32 %v437_v42, %v400_v43  ;;  %v532_v45 = vpop.f32.mrb[5].mxu0 }
 0x2e0   :  { %v403_v46 = vpop.f32.mrb[6].mxu0 }
 0x2e1   :  { %v446_v47 = vmul.f32 -1.442695, %v401_v44  ;;  %v533_v48 = vpop.f32.mrb[7].mxu0 }
 0x2e3   :  { %565 = vpow2.f32 %v446_v47 }
 0x2ed   :  { %v566_v49 = vpop.eup %565 }
 0x2ee   :  { %v409_v50 = vadd.f32 1.0, %v566_v49 }
 0x2f0   :  { %567 = vrcp.f32 %v409_v50 }
 0x2fa   :  { %v568_v51 = vpop.eup %567 }
 0x2fb   :  { %412 = vst [vmem:[%s790_s7] sm:$0xff] %v568_v51 }
 0x2fc   :  { %417 = vsyncpa [#allocation3], 1 }
 0x2fd   :  { %418 = vsyncpa [#allocation5], 1 }

</bundles_post_ra>
